<compile_context>
chip_gen: v7x
topology: tpu7x:2x2x1
jax: 0.10.0
libtpu: 0.0.40
codegen_flags: <defaults>
</compile_context>

<pallas_src>
import jax
import jax.numpy as jnp
from jax import lax
from jax.experimental import pallas as pl
from jax.experimental.pallas import tpu as pltpu


def _round_up(n: int, m: int) -> int:
    return ((n + m - 1) // m) * m


# ---------------------------------------------------------------------------
# Shared-weight kernel (per_channel=False): chunked lower-triangular matmul.
# ---------------------------------------------------------------------------
def _ema_mxu_kernel(x_ref, m_ref, d_ref, o_ref, carry_ref):
    """One (batch, time-chunk) program.

    x_ref, o_ref : (L, C) VMEM tiles (batch dim squeezed out).
    m_ref        : (L, L) lower-triangular Toeplitz EMA matrix (f32).
    d_ref        : (L, 1) decay vector (1-w)^(i+1) (f32).
    carry_ref    : (1, C) f32 VMEM scratch carrying the last output row
                   of the previous chunk across the "arbitrary" time axis.
    """
    t = pl.program_id(1)

    @pl.when(t == 0)
    def _init_carry():
        # initial_state = x[:, 0, :]; the t=0 update is still applied via M/d,
        # reproducing w*x0 + (1-w)*x0 exactly like the reference scan.
        carry_ref[...] = x_ref[0:1, :].astype(jnp.float32)

    x = x_ref[...].astype(jnp.float32)                               # (L, C)
    y = jnp.dot(m_ref[...], x, preferred_element_type=jnp.float32)   # MXU matmul
    y = y + d_ref[...] * carry_ref[...]                              # (L,1)*(1,C)
    o_ref[...] = y.astype(o_ref.dtype)                               # lane-dense slab
    carry_ref[...] = y[-1:, :]


# ---------------------------------------------------------------------------
# Per-channel kernel: Hillis-Steele doubling scan on full-width vregs.
#   combine((A1,B1),(A2,B2)) = (A1*A2, A2*B1 + B2),  y_i = B_i + A_i * carry
# ---------------------------------------------------------------------------
def _ema_scan_kernel(x_ref, w_ref, o_ref, carry_ref):
    t = pl.program_id(1)
    L = x_ref.shape[0]

    w = jnp.clip(w_ref[...].astype(jnp.float32), 0.0, 1.0)           # (1, C)

    @pl.when(t == 0)
    def _init_carry():
        carry_ref[...] = x_ref[0:1, :].astype(jnp.float32)

    x = x_ref[...].astype(jnp.float32)                                # (L, C)
    b_acc = w * x                                                     # B_i = w*x_i
    a_acc = jnp.broadcast_to(1.0 - w, x.shape)                        # A_i = 1-w
    row = lax.broadcasted_iota(jnp.int32, x.shape, 0)

    s = 1
    while s < L:                                                      # log2(L) passes
        valid = row >= s
        a_sh = jnp.where(valid, pltpu.roll(a_acc, shift=s, axis=0), 1.0)
        b_sh = jnp.where(valid, pltpu.roll(b_acc, shift=s, axis=0), 0.0)
        b_acc = b_acc + a_acc * b_sh
        a_acc = a_acc * a_sh
        s *= 2

    y = b_acc + a_acc * carry_ref[...]
    o_ref[...] = y.astype(o_ref.dtype)
    carry_ref[...] = y[-1:, :]


# ---------------------------------------------------------------------------
# Wrapper
# ---------------------------------------------------------------------------
def exponential_moving_average(x, weights, *, skip_transpose=False, max_chunk=256):
    """Pallas equivalent of ExponentialMovingAverage.forward.

    x        : (batch, time, channels) if skip_transpose=False (default),
               (batch, channels, time) if skip_transpose=True.
    weights  : (1,) shared or (channels,) per-channel float32 parameter.
    max_chunk: time-chunk length L (256 targets the 256-wide MXU on v6e/v7x;
               use 128 on v5e).  Time is tiled so per-block VMEM stays small.
    """
    orig_dtype = x.dtype
    if skip_transpose:
        # TODO(synk): read the (B, C, T) layout natively (X @ M^T) instead of
        # round-tripping through HBM with these wrapper transposes.
        x_btc = jnp.transpose(x, (0, 2, 1))
    else:
        x_btc = x

    B, T, C = x_btc.shape
    weights = jnp.asarray(weights, dtype=jnp.float32).reshape(-1)
    per_channel = weights.shape[0] != 1

    max_chunk = max(8, _round_up(int(max_chunk), 8))
    L = min(max_chunk, _round_up(T, 8))
    T_pad = _round_up(T, L)
    if T_pad != T:
        # Zero-pad the tail; the recurrence is causal, so valid outputs are
        # unaffected and padded rows are sliced off below.
        x_btc = jnp.pad(x_btc, ((0, 0), (0, T_pad - T), (0, 0)))
    n_chunks = T_pad // L

    grid = (B, n_chunks)
    x_spec = pl.BlockSpec((None, L, C), lambda b, t: (b, t, 0))
    o_spec = pl.BlockSpec((None, L, C), lambda b, t: (b, t, 0))
    out_shape = jax.ShapeDtypeStruct((B, T_pad, C), x_btc.dtype)
    compiler_params = pltpu.CompilerParams(
        dimension_semantics=("parallel", "arbitrary"))

    if not per_channel:
        # Build the chunk EMA operator once (f32): M[i,j] = w*(1-w)^(i-j), i>=j.
        w = jnp.clip(weights[0], 0.0, 1.0)
        a = 1.0 - w
        idx = jnp.arange(L, dtype=jnp.float32)
        diff = idx[:, None] - idx[None, :]
        m_mat = jnp.where(diff >= 0.0,
                          w * jnp.power(a, jnp.maximum(diff, 0.0)),
                          0.0).astype(jnp.float32)
        d_vec = jnp.power(a, idx + 1.0).reshape(L, 1).astype(jnp.float32)

        out = pl.pallas_call(
            _ema_mxu_kernel,
            out_shape=out_shape,
            grid_spec=pltpu.PrefetchScalarGridSpec(
                num_scalar_prefetch=0,
                grid=grid,
                in_specs=[
                    x_spec,
                    pl.BlockSpec((L, L), lambda b, t: (0, 0)),
                    pl.BlockSpec((L, 1), lambda b, t: (0, 0)),
                ],
                out_specs=o_spec,
                scratch_shapes=[pltpu.VMEM((1, C), jnp.float32)],
            ),
            compiler_params=compiler_params,
        )(x_btc, m_mat, d_vec)
    else:
        assert weights.shape[0] == C, "per-channel weights must match channels"
        w2d = weights.reshape(1, C)
        out = pl.pallas_call(
            _ema_scan_kernel,
            out_shape=out_shape,
            grid_spec=pltpu.PrefetchScalarGridSpec(
                num_scalar_prefetch=0,
                grid=grid,
                in_specs=[
                    x_spec,
                    pl.BlockSpec((1, C), lambda b, t: (0, 0)),
                ],
                out_specs=o_spec,
                scratch_shapes=[pltpu.VMEM((1, C), jnp.float32)],
            ),
            compiler_params=compiler_params,
        )(x_btc, w2d)

    if T_pad != T:
        out = out[:, :T, :]
    if skip_transpose:
        out = jnp.transpose(out, (0, 2, 1))
    return out.astype(orig_dtype)


# ---------------------------------------------------------------------------
# Pure-JAX reference mirroring the torch module (skip_transpose=False layout).
# ---------------------------------------------------------------------------
def _reference_ema(x, weights):
    w = jnp.clip(weights.astype(jnp.float32), 0.0, 1.0).astype(x.dtype)  # (1,) or (C,)
    init = x[:, 0, :]                                                    # (B, C)

    def step(acc, xt):                                                   # xt: (B, C)
        acc = w * xt + (1.0 - w) * acc
        return acc, acc

    xs = jnp.transpose(x, (1, 0, 2))                                     # (T, B, C)
    _, ys = lax.scan(step, init, xs)                                     # (T, B, C)
    return jnp.transpose(ys, (1, 0, 2))                                  # (B, T, C)


if __name__ == "__main__":
    key = jax.random.PRNGKey(0)
    k1, k2, k3 = jax.random.split(key, 3)

    coeff_init = 0.04
    B, T, C = 2, 16, 32

    # --- Test 1: module defaults (shared weight, skip_transpose=False) ---
    w_shared = jnp.ones((1,), dtype=jnp.float32) * coeff_init
    x1 = jax.random.uniform(k1, (B, T, C), dtype=jnp.float32)
    out1 = jax.block_until_ready(exponential_moving_average(x1, w_shared))
    ref1 = _reference_ema(x1, w_shared)
    assert out1.shape == x1.shape and out1.dtype == x1.dtype
    assert jnp.allclose(out1, ref1, atol=2e-5, rtol=2e-5), "shared-weight mismatch"

    # --- Test 2: multi-chunk time tiling (carry across chunks) + tail padding ---
    B2, T2, C2 = 2, 20, 32
    x2 = jax.random.uniform(k2, (B2, T2, C2), dtype=jnp.float32)
    out2 = jax.block_until_ready(
        exponential_moving_average(x2, w_shared, max_chunk=8))
    ref2 = _reference_ema(x2, w_shared)
    assert out2.shape == x2.shape
    assert jnp.allclose(out2, ref2, atol=2e-5, rtol=2e-5), "chunked-carry mismatch"

    # --- Test 3: per-channel weights (associative-scan kernel) ---
    w_pc = jax.random.uniform(k3, (C,), dtype=jnp.float32) * 0.5 + 0.02
    out3 = jax.block_until_ready(exponential_moving_average(x1, w_pc))
    ref3 = _reference_ema(x1, w_pc)
    assert out3.shape == x1.shape
    assert jnp.allclose(out3, ref3, atol=2e-5, rtol=2e-5), "per-channel mismatch"

    print("KERNEL_OK")
</pallas_src>

<mosaic_0001>
module attributes {stable_mosaic.version = 11 : i64} {
  func.func @_ema_mxu_kernel(%arg0: i32, %arg1: i32, %arg2: memref<1x16x32xf32, #tpu.memory_space<vmem>>, %arg3: memref<16x16xf32, #tpu.memory_space<vmem>>, %arg4: memref<16x1xf32, #tpu.memory_space<vmem>>, %arg5: memref<1x16x32xf32, #tpu.memory_space<vmem>>, %arg6: memref<1x32xf32, #tpu.memory_space<vmem>>) attributes {dimension_semantics = [#tpu.dimension_semantics<parallel>, #tpu.dimension_semantics<arbitrary>], iteration_bounds = array<i64: 2, 1>, scalar_prefetch = 0 : i64, scratch_operands = 1 : i64, tpu.core_type = #tpu.core_type<tc>, window_params = [{transform_indices = @transform_0, window_bounds = array<i64: 1, 16, 32>}, {pipeline_mode = #tpu.pipeline_mode<synchronous>, transform_indices = @transform_1, window_bounds = array<i64: 16, 16>}, {pipeline_mode = #tpu.pipeline_mode<synchronous>, transform_indices = @transform_2, window_bounds = array<i64: 16, 1>}, {transform_indices = @transform_3, window_bounds = array<i64: 1, 16, 32>}]} {
    %c0_i32 = arith.constant 0 : i32
    %0 = arith.cmpi eq, %arg1, %c0_i32 : i32
    %1 = arith.extui %0 : i1 to i32
    %c0_i32_0 = arith.constant 0 : i32
    %2 = arith.cmpi ne, %1, %c0_i32_0 : i32
    scf.if %2 {
      %c0_14 = arith.constant 0 : index
      %c0_15 = arith.constant 0 : index
      %c0_16 = arith.constant 0 : index
      %18 = vector.load %arg2[%c0_14, %c0_15, %c0_16] : memref<1x16x32xf32, #tpu.memory_space<vmem>>, vector<1x1x32xf32>
      %19 = vector.shape_cast %18 : vector<1x1x32xf32> to vector<1x32xf32>
      %c0_17 = arith.constant 0 : index
      %c0_18 = arith.constant 0 : index
      %20 = vector.load %arg6[%c0_17, %c0_18] : memref<1x32xf32, #tpu.memory_space<vmem>>, vector<1x32xf32>
      tpu.vector_store %arg6[%c0_17, %c0_18], %19 {strides = array<i32>} : memref<1x32xf32, #tpu.memory_space<vmem>>, vector<1x32xf32>,
    } else {
    }
    %c0 = arith.constant 0 : index
    %c0_1 = arith.constant 0 : index
    %c0_2 = arith.constant 0 : index
    %3 = vector.load %arg2[%c0, %c0_1, %c0_2] : memref<1x16x32xf32, #tpu.memory_space<vmem>>, vector<1x16x32xf32>
    %4 = vector.shape_cast %3 : vector<1x16x32xf32> to vector<16x32xf32>
    %c0_3 = arith.constant 0 : index
    %c0_4 = arith.constant 0 : index
    %5 = vector.load %arg3[%c0_3, %c0_4] : memref<16x16xf32, #tpu.memory_space<vmem>>, vector<16x16xf32>
    %cst = arith.constant dense<0.000000e+00> : vector<16x32xf32>
    %6 = tpu.matmul %5, %4, %cst {dimension_numbers = #tpu.dot_dimension_numbers<[1], [0], [0], [1], [0, 0, 1, 1], [], []>} : vector<16x16xf32>, vector<16x32xf32>, vector<16x32xf32> -> vector<16x32xf32>
    %c0_5 = arith.constant 0 : index
    %c0_6 = arith.constant 0 : index
    %7 = vector.load %arg4[%c0_5, %c0_6] : memref<16x1xf32, #tpu.memory_space<vmem>>, vector<16x1xf32>
    %c0_7 = arith.constant 0 : index
    %c0_8 = arith.constant 0 : index
    %8 = vector.load %arg6[%c0_7, %c0_8] : memref<1x32xf32, #tpu.memory_space<vmem>>, vector<1x32xf32>
    %9 = vector.broadcast %7 : vector<16x1xf32> to vector<16x32xf32>
    %10 = vector.broadcast %8 : vector<1x32xf32> to vector<16x32xf32>
    %11 = arith.mulf %9, %10 : vector<16x32xf32>
    %12 = arith.addf %6, %11 : vector<16x32xf32>
    %c0_9 = arith.constant 0 : index
    %c0_10 = arith.constant 0 : index
    %c0_11 = arith.constant 0 : index
    %13 = vector.load %arg5[%c0_9, %c0_10, %c0_11] : memref<1x16x32xf32, #tpu.memory_space<vmem>>, vector<1x16x32xf32>
    %14 = vector.shape_cast %13 : vector<1x16x32xf32> to vector<16x32xf32>
    %15 = vector.shape_cast %12 : vector<16x32xf32> to vector<1x16x32xf32>
    tpu.vector_store %arg5[%c0_9, %c0_10, %c0_11], %15 {strides = array<i32>} : memref<1x16x32xf32, #tpu.memory_space<vmem>>, vector<1x16x32xf32>,
    %16 = vector.extract_strided_slice %12 {offsets = [15, 0], sizes = [1, 32], strides = [1, 1]} : vector<16x32xf32> to vector<1x32xf32>
    %c0_12 = arith.constant 0 : index
    %c0_13 = arith.constant 0 : index
    %17 = vector.load %arg6[%c0_12, %c0_13] : memref<1x32xf32, #tpu.memory_space<vmem>>, vector<1x32xf32>
    tpu.vector_store %arg6[%c0_12, %c0_13], %16 {strides = array<i32>} : memref<1x32xf32, #tpu.memory_space<vmem>>, vector<1x32xf32>,
    return
  }
  func.func @transform_0(%arg0: i32, %arg1: i32) -> (i32, i32, i32) {
    %c0_i32 = arith.constant 0 : i32
    %c0_i32_0 = arith.constant 0 : i32
    return %arg0, %arg1, %c0_i32 : i32, i32, i32
  }
  func.func @transform_1(%arg0: i32, %arg1: i32) -> (i32, i32) {
    %c0_i32 = arith.constant 0 : i32
    %c0_i32_0 = arith.constant 0 : i32
    %c0_i32_1 = arith.constant 0 : i32
    return %c0_i32, %c0_i32_0 : i32, i32
  }
  func.func @transform_2(%arg0: i32, %arg1: i32) -> (i32, i32) {
    %c0_i32 = arith.constant 0 : i32
    %c0_i32_0 = arith.constant 0 : i32
    %c0_i32_1 = arith.constant 0 : i32
    return %c0_i32, %c0_i32_0 : i32, i32
  }
  func.func @transform_3(%arg0: i32, %arg1: i32) -> (i32, i32, i32) {
    %c0_i32 = arith.constant 0 : i32
    %c0_i32_0 = arith.constant 0 : i32
    return %arg0, %arg1, %c0_i32 : i32, i32, i32
  }
}

</mosaic_0001>

<bundles_post_ra>
// kernel: tpu_custom_call.1
= control target key start
LH: loop header
LB: loop body
LE: loop exit
PB: predicated region body
PF: predicated region fallthrough
CT: control target
= control target key end

     0   :  { %8 = vsyncpa [#allocation4], 0  ;;  %s864_s0 = inlined_call_operand.hbm [shape: f32[2,16,32], index: 0, kind: input, shape index: {}]   ;;  %s865_s1 = inlined_call_operand.vmem [shape: f32[16,16], index: 1, kind: input, shape index: {}]   ;;  %s866_s2 = inlined_call_operand.vmem [shape: f32[16,1], index: 2, kind: input, shape index: {}]   ;;  %s867_s3 = inlined_call_operand.hbm [shape: f32[2,16,32], index: 3, kind: output, shape index: {}]  }
   0x1   :  { %10 = vsyncpa [#allocation4 + $0x1], 0 }
   0x2   :  { %11 = vsyncpa [#allocation5], 0 }
   0x3   :  { %13 = vsyncpa [#allocation5 + $0x1], 0  ;;  %s675_s12 = smov 0   ;;  %s677_s13 = smov 0  }
   0x4   :  { %s679_s14 = smov 0   ;;  %s681_s15 = smov 0  }
   0x5   :  { %s683_s16 = smov 0   ;;  %s685_s17 = smov 0  }
   0x6 LB: > { %s431_s18 = sadd.s32 4294967295, %s646_s17   ;;  %s432_s19 = sadd.s32 4294967294, %s646_s17   ;;  %s646_s17 = sphi %s685_s17, %s19_s17   ;;  %s642_s16 = sphi %s683_s16, %s882_s16   ;;  %s638_s15 = sphi %s681_s15, %s881_s15   ;;  %s634_s14 = sphi %s679_s14, %s880_s14   ;;  %s630_s13 = sphi %s677_s13, %s879_s13   ;;  %s626_s12 = sphi %s675_s12, %s878_s12  }
   0x7   : > { %s31_s20 = sadd.s32 1, %s642_s16  ;;  %s40_s21 = sadd.s32 1, %s634_s14 }
   0x8   : > { %p33_p0 = scmp.ge.s32.totalorder %s31_s20, 2  ;;  %p47_p1 = scmp.ne.s32.totalorder %s634_s14, %s630_s13 }
   0x9   : > { %p48_p2 = scmp.eq.s32.totalorder %s646_s17, 0  ;;  %p53_p3 = scmp.ne.s32.totalorder %s630_s13, %s626_s12 }
   0xa   : > { %s884_s20 = smov (%p33_p0, %s31_s20), 0  ;;  %p54_p5 = scmp.eq.s32.totalorder %s431_s18, 0 }
   0xb   : > { %p716_p4 = por %p48_p2, %p47_p1  ;;  %s35_s23 = ssub.s32 %s642_s16, %s884_s20 }
   0xc   : > { %p121_p6 = scmp.eq.s32.totalorder %s431_s18, 1  ;;  %p38_p7 = scmp.eq.s32.totalorder %s35_s23, 0 }
   0xd   : > { %p722_p8 = por %p54_p5, %p53_p3  ;;  %p127_p10 = scmp.eq.s32.totalorder %s432_s19, 1 }
   0xe   : > { %p726_p9 = por %p121_p6, %p47_p1  ;;  %p478_p13 = scmp.lt.s32.totalorder %s646_s17, 2 }
   0xf   : > { %s731_s26 = scalar_select %p38_p7, %s634_s14, %s40_s21  }
  0x10   : > { %s871_s25 = scalar_select %p726_p9, 1, 0 }
  0x11   : > { %p733_p11 = por %p127_p10, %p53_p3  ;;  %s153_s28 = sand.u32 1, %s634_s14  }
  0x12   : > { %s435_s29 = sshll.u32 %s153_s28, 4  ;;  %s449_s30 = sshll.u32 %s642_s16, 8 }
  0x13   : > { %s872_s27 = scalar_select %p733_p11, 1, 0 }
  0x14   : > { %s744_s6 = scalar_lea.hbm %s864_s0, %s449_s30  ;;  %s157_s7 = scalar_lea.vmem [#allocation3], %s435_s29 }
  0x15   : > { %s166_s8 = sshll.u32 %s157_s7, 4  ;;  %p750_p0 = pnand %p478_p13, %p716_p4  ;;  %s746_s8 = int_to_ptr.vmem [resolvable:$true] %s166_s8 }
  0x16   : > { %s755_s10 = scalar_lea.sflag [#allocation4], %s153_s28  ;;  %s534_s11 = scalar_lea.hbm %s744_s6, 256 }
  0x17   : > { %p535_p2 = scmp.ne.s32.totalorder %s744_s6, %s534_s11  ;;  %p536_p3 = pneg %p750_p0 }
  0x18   : > { %s539_s21 = scalar_lea.hbm %s864_s0, 512  ;;  %p540_p4 = scmp.lt.u32.totalorder %s744_s6, %s864_s0 }
  0x19   : > { %p537_p5 = pnand %p536_p3, %p535_p2  ;;  %p541_p7 = scmp.lt.u32.totalorder %s539_s21, %s534_s11 }
  0x1a   : > { %p543_p13 = scmp.lt.u32.totalorder %s534_s11, %s744_s6 }
  0x1b   : > { %p538_p6 = pneg %p537_p5  ;;  %p542_p10 = por %p541_p7, %p540_p4 }
  0x1d   : > { %p544_p12 = por %p543_p13, %p542_p10 }
  0x1f   : > { %p545_p1 = pnand %p544_p12, %p538_p6 }
  0x21   : > { %548 = shalt.err (!%p545_p1)
}
  0x22   : > { %s549_s28 = scalar_lea.vmem %s746_s8, 256  ;;  %s648_s29 = smov [#allocation3]  }
  0x23   : > { %p550_p2 = scmp.ne.s32.totalorder %s746_s8, %s549_s28  ;;  %s554_s30 = sshll.u32 %s648_s29, 4  ;;  %s555_s30 = int_to_ptr.vmem [resolvable:$false] %s554_s30 }
  0x24   : > { %s556_s4 = scalar_lea.vmem %s555_s30, 512  ;;  %p557_p9 = scmp.lt.s32.totalorder %s746_s8, %s555_s30 }
  0x25   : > { %p552_p5 = pnand %p550_p2, %p536_p3  ;;  %p558_p4 = scmp.lt.s32.totalorder %s556_s4, %s549_s28 }
  0x27   : > { %p553_p11 = pneg %p552_p5  ;;  %p559_p7 = por %p558_p4, %p557_p9 }
  0x29   : > { %p560_p10 = pnand %p559_p7, %p553_p11 }
  0x2b   : > { %563 = shalt.err (!%p560_p10)
}
  0x2c   : > { %s649_s5 = smov 128   ;;  %s650_s7 = smov 8  }
  0x2d   : > { %473 = dma.hbm_to_vmem [thread:$0]  (!%p750_p0), %s744_s6, 256, %s746_s8, %s755_s10, %s649_s5, %s649_s5, %s650_s7  }
  0x2e   : > { %p174_p12 = scmp.lt.s32.totalorder %s646_s17, 3  ;;  %p874_p1 = scmp.ge.s32.totalorder %s646_s17, 1 }
  0x30   : > { %p175_p3 = pnand %p874_p1, %p174_p12 }
  0x31   : > { %s787_s11 = sand.u32 (!%p175_p3), 1, %s630_s13  }
  0x32   : > { %178 = sbr.rel (%p175_p3) target bundleno = 296 (0x128), region = 32  ;;  %s439_s18 = sshll.u32 (!%p175_p3), %s787_s11, 4 }
  0x33   : > { %s181_s19 = scalar_lea.sflag (!%p175_p3), [#allocation4], %s787_s11  ;;  %s184_s21 = scalar_lea.vmem (!%p175_p3), [#allocation3], %s439_s18 }
  0x39   : > { %617 = dma.done.wait (%p722_p8), %s181_s19, 256  }
  0x3a   : > { %619 = vsyncadd (%p722_p8), %s181_s19, 4294967040  ;;  %v651_v0 = vmov 0   ;;  %vm241_vm0 = vcmask 130048   ;;  %v216_v1 = vld [vmem:[%s184_s21] sm:$0xff]  ;;  %v217_v2 = vld [vmem:[%s184_s21 + $0x8] sm:$0xff]  ;;  %vm214_vm1 = vcmask 253952  }
  0x3b   : > { %533 = vset.pattern.permute.xlu0 %v651_v0  ;;  %v218_v3 = vld [vmem:[%s865_s1] sm:$0xff]  ;;  %v462_v4 = vpack.c.bf16 %v217_v2, %v216_v1  ;;  %v221_v7 = vld [vmem:[%s866_s2 + $0x8] sm:$0xff]  ;;  %s206_s29 = scalar_lea.vmem [#allocation6], %s439_s18  ;;  %s450_s4 = sshll.u32 %s638_s15, 8  ;;  %vm323_vm2 = vcmask 261120   ;;  %vm326_vm3 = vcmask 261127  }
  0x3c   : > { %459 = vmatprep.mubr.msk.f32.mxu0 %vm241_vm0, %v218_v3  ;;  %v220_v5 = vld [vmem:[%s866_s2] sm:$0xff]  ;;  %v219_v8 = vld [vmem:[%s865_s1 + $0x8] sm:$0xff]  ;;  %s344_s30 = sshll.u32 %s206_s29, 4  ;;  %s815_s18 = scalar_lea.hbm %s867_s3, %s450_s4  ;;  %s810_s30 = int_to_ptr.vmem [resolvable:$true] %s344_s30 }
  0x3d   : > { %225 = vperm.xlu0 %533, %v220_v5   ;;  %v213_v6 = vld [vmem:[%s184_s21] sm:$0x1]  ;;  %463 = vmatprep.subr.bf16.mxu0 %v462_v4  ;;  %s329_s15 = scalar_lea.sflag [#allocation5], %s787_s11  ;;  %s564_s19 = scalar_lea.vmem %s810_s30, 256 }
  0x3e   : > { %215 = vst.msk [vmem:[#allocation2] sm:$0x1] %vm214_vm1, %v213_v6  ;;  %465 = vmatpush3.bf16.msra.mxu0 %v462_v4  ;;  %p565_p8 = scmp.ne.s32.totalorder %s810_s30, %s564_s19  ;;  %p875_p9 = scmp.ne.s32.totalorder %s871_s25, 0 }
  0x3f   : > { %s652_s21 = smov [#allocation6]  }
  0x40   : > { %p566_p11 = pnand %p565_p8, %p875_p9  ;;  %s568_s6 = sshll.u32 %s652_s21, 4  ;;  %s569_s6 = int_to_ptr.vmem [resolvable:$false] %s568_s6 }
  0x41   : > { %230 = vperm.xlu0 %533, %v221_v7   ;;  %460 = vmatmul.mubr.msk.f32.vlgmr.msra.gmra.mrb[0].mxu0 %vm241_vm0, %v219_v8  ;;  %s570_s8 = scalar_lea.vmem %s569_s6, 512  ;;  %p571_p6 = scmp.lt.s32.totalorder %s810_s30, %s569_s6 }
  0x42   : > { %p567_p0 = pneg %p566_p11  ;;  %p572_p13 = scmp.lt.s32.totalorder %s570_s8, %s564_s19 }
  0x44   : > { %p573_p2 = por %p572_p13, %p571_p6 }
  0x45   : > { %v441_v10 = vld [vmem:[#allocation2] ss:$0 sm:$0xff] }
  0x46   : > { %p574_p5 = pnand %p573_p2, %p567_p0 }
  0xbc   : > { %v226_v9 = vpop.permute.xlu0 %225 }
  0xbd   : > { %v239_v13 = vmul.f32 %v441_v10, %v226_v9 }
  0xc0   : > { %v231_v11 = vpop.permute.xlu0 %230 }
  0xc1   : > { %v240_v12 = vmul.f32 %v441_v10, %v231_v11 }
 0x114   : > { %v461_v14 = vpop.f32.mrb[0].mxu0 }
 0x115   : > { %v320_v15 = vadd.f32 %v461_v14, %v240_v12  ;;  %v314_v16 = vpop.f32.mrb[1].mxu0 }
 0x116   : > { %v315_v17 = vadd.f32 %v314_v16, %v239_v13 }
 0x117   : > { %325 = vst.msk [vmem:[%s206_s29 + $0x8] sm:$0xff] %vm323_vm2, %v320_v15 }
 0x118   : > { %327 = vst.msk [vmem:[#allocation2 - $0x7] sm:$0x80] %vm326_vm3, %v320_v15 }
 0x119   : > { %324 = vst.msk [vmem:[%s206_s29] sm:$0xff] %vm323_vm2, %v315_v17 }
 0x11a   : > { %577 = shalt.err (!%p574_p5)
}
 0x11b   : > { %s578_s9 = scalar_lea.hbm %s815_s18, 256  ;;  %s582_s22 = scalar_lea.hbm %s867_s3, 512 }
 0x11c   : > { %p579_p4 = scmp.ne.s32.totalorder %s815_s18, %s578_s9  ;;  %p583_p12 = scmp.lt.u32.totalorder %s815_s18, %s867_s3 }
 0x11d   : > { %p584_p1 = scmp.lt.u32.totalorder %s582_s22, %s578_s9  ;;  %p586_p8 = scmp.lt.u32.totalorder %s578_s9, %s815_s18 }
 0x11e   : > { %p580_p7 = pnand %p579_p4, %p875_p9 }
 0x11f   : > { %p585_p3 = por %p584_p1, %p583_p12 }
 0x120   : > { %p581_p10 = pneg %p580_p7 }
 0x121   : > { %p587_p11 = por %p586_p8, %p585_p3 }
 0x123   : > { %p588_p0 = pnand %p587_p11, %p581_p10 }
 0x125   : > { %591 = shalt.err (!%p588_p0)
}
 0x126   : > { %s653_s29 = smov 128   ;;  %s654_s4 = smov 8  }
 0x127   : > { %468 = dma.vmem_to_hbm [thread:$0]  (%p875_p9), %s810_s30, 256, %s815_s18, %s329_s15, %s653_s29, %s653_s29, %s654_s4  }
 0x128 PF: > { %s359_s5 = sand.u32 1, %s626_s12   ;;  %p876_p6 = scmp.ne.s32.totalorder %s872_s27, 0 }
 0x129   : > { %p877_p13 = scmp.ge.s32.totalorder %s646_s17, 2  ;;  %s360_s7 = scalar_lea.sflag [#allocation5], %s359_s5 }
 0x12b   : > { %p475_p2 = pnand %p877_p13, %p876_p6 }
 0x12d   : > { %621 = dma.done.wait (!%p475_p2), %s360_s7, 256  }
 0x12e   : > { %623 = vsyncadd (!%p475_p2), %s360_s7, 4294967040  ;;  %s19_s17 = sadd.s32 1, %s646_s17   ;;  %s878_s12 = smov %s630_s13 }
 0x12f   : > { %p16_p5 = scmp.ge.s32.totalorder %s19_s17, 4   ;;  %s879_s13 = smov %s634_s14 }
 0x130   : > { %s880_s14 = smov %s731_s26  ;;  %s881_s15 = smov %s642_s16 }
 0x131   : > { %s882_s16 = smov %s884_s20  ;;  %18 = sbr.rel (!%p16_p5) target bundleno = 6 (0x6), region = 81 }
 0x138   :  { %365 = vsyncpa [#allocation4], 1 }
 0x139   :  { %367 = vsyncpa [#allocation4 + $0x1], 1 }
 0x13a   :  { %368 = vsyncpa [#allocation5], 1 }
 0x13b   :  { %370 = vsyncpa [#allocation5 + $0x1], 1 }

</bundles_post_ra>
